<compile_context>
chip_gen: v6e
topology: v6e:2x2x1
jax: 0.10.0
libtpu: 0.0.40
codegen_flags: <defaults>
</compile_context>

<pallas_src>
import jax
import jax.numpy as jnp
from jax.experimental import pallas as pl
from jax.experimental.pallas import tpu as pltpu

NEG_SLOPE = 0.01  # torch.nn.LeakyReLU default


def _leaky_relu(x):
    return jnp.where(x > 0, x, NEG_SLOPE * x)


def conv1x1_mlp_kernel(x_ref, w1_ref, b1_ref, w2_ref, b2_ref, w3_ref, b3_ref, o_ref):
    # x_ref: (C_in, tp) pixels-on-lanes tile; w*: (out, in); b*: (out, 1);
    # o_ref: (C_out, tp) lane-dense output tile.
    x = x_ref[...]
    if x.dtype != w1_ref.dtype:          # no-op cast when x already matches weights
        x = x.astype(w1_ref.dtype)
    h = jnp.dot(w1_ref[...], x, preferred_element_type=jnp.float32)
    h = _leaky_relu(h + b1_ref[...])
    h = jnp.dot(w2_ref[...], h.astype(w2_ref.dtype), preferred_element_type=jnp.float32)
    h = _leaky_relu(h + b2_ref[...])
    o = jnp.dot(w3_ref[...], h.astype(w3_ref.dtype), preferred_element_type=jnp.float32)
    o_ref[...] = (o + b3_ref[...]).astype(o_ref.dtype)


def _vmem_capacity_bytes():
    try:
        return int(pltpu.get_tpu_info().vmem_capacity_bytes)
    except Exception:
        return 64 << 20  # conservative fallback (v7x per-TensorCore VMEM)


def _round_down_128(v):
    return (v // 128) * 128


def _pick_pixel_tile(hw, n_batch, c_in, c_out, hidden, x_itemsize, vmem_cap):
    """Pick the lane (pixel) tile size `tp`, sized by bytes.

    Target a ~2 MiB x tile (amortizes the ~0.35 us/step grid overhead and gives
    long contiguous HBM runs), then cap so double-buffered x/out tiles plus the
    live f32 intermediates (3*hidden*tp*4 B) fit the generation's VMEM budget.
    Returns tp == hw (one block) or a multiple of 128 (last block masked).
    """
    target_x_tile_bytes = 2 << 20
    budget = int(0.6 * vmem_cap)  # headroom for weights + compiler scratch

    tp = target_x_tile_bytes // max(1, c_in * x_itemsize)
    per_lane_bytes = (
        2 * c_in * x_itemsize      # x tile, double buffered
        + 2 * c_out * x_itemsize   # out tile, double buffered
        + 3 * hidden * 4           # f32 intermediates (bounds spill traffic too)
    )
    tp = min(tp, budget // max(1, per_lane_bytes))
    tp = max(128, _round_down_128(tp))

    if hw <= tp:
        if n_batch == 1 and hw > 128:
            # Guarantee >=2 parallel grid steps so both TensorCores on a
            # dual-core chip (v7x) get work even for a single image.
            return 128 * pl.cdiv(hw, 2 * 128)
        return hw  # full spatial extent in one block (always legal, no padding)
    return tp      # multiple of 128; final partial block handled by masking


def conv2d1x1_forward(x_nchw, params):
    """x_nchw: (N, C_in, H, W). Returns (N, C_out, H, W)."""
    w1, b1, w2, b2, w3, b3 = params
    N, C_in, H, W = x_nchw.shape
    hidden = w1.shape[0]
    C_out = w3.shape[0]
    HW = H * W

    # Free reshape: NCHW-native, flattened spatial axis lands on lanes.
    x3d = x_nchw.reshape(N, C_in, HW)

    vmem_cap = _vmem_capacity_bytes()
    x_itemsize = x_nchw.dtype.itemsize
    tp = _pick_pixel_tile(HW, N, C_in, C_out, hidden, x_itemsize, vmem_cap)
    grid = (N, pl.cdiv(HW, tp))   # no input pad / output slice: last block masked

    # Per-generation scoped-VMEM budget: double-buffered x/out tiles + weights +
    # f32 intermediates, 2x headroom, floored at the 32 MiB scoped default and
    # capped at 75% of physical VMEM (48 MiB on v7x, 96 MiB on v5e/v6e).
    weight_bytes = sum(int(p.size) * p.dtype.itemsize for p in params)
    est = (
        2 * C_in * tp * x_itemsize
        + 2 * C_out * tp * x_itemsize
        + weight_bytes
        + 3 * hidden * tp * 4
    )
    usable = int(0.75 * vmem_cap)
    vmem_limit = int(min(max(2 * est, min(32 << 20, usable)), usable))

    # NOTE: channel dims (C_in=4, C_out=8, ...) smaller than the sublane tile
    # are padded internally by Mosaic; pre-padding them to multiples of 8 (f32)
    # / 16 (bf16) in the wrapper is a tiny optional win and is skipped here.

    def build_specs(fancy):
        const_kw, x_kw = {}, {}
        if fancy:
            # Grid-invariant weights/biases never re-DMA: single-buffer them.
            const_kw = dict(pipeline_mode=pl.Buffered(1))
            # Tiny per-step x tiles with many steps are DMA-latency bound:
            # a third in-flight buffer hides HBM latency cheaply.
            if C_in * tp * x_itemsize < (512 << 10) and grid[0] * grid[1] > 2:
                x_kw = dict(pipeline_mode=pl.Buffered(3))

        def const_spec(shape):  # grid-invariant weight / bias blocks
            return pl.BlockSpec(shape, lambda b, p: (0,) * len(shape), **const_kw)

        in_specs = [
            pl.BlockSpec((None, C_in, tp), lambda b, p: (b, 0, p), **x_kw),  # x tile
            const_spec((hidden, C_in)),    # W1
            const_spec((hidden, 1)),       # b1
            const_spec((hidden, hidden)),  # W2
            const_spec((hidden, 1)),       # b2
            const_spec((C_out, hidden)),   # W3
            const_spec((C_out, 1)),        # b3
        ]
        out_specs = pl.BlockSpec((None, C_out, tp), lambda b, p: (b, 0, p))
        return in_specs, out_specs

    def run(fancy):
        in_specs, out_specs = build_specs(fancy)
        return pl.pallas_call(
            conv1x1_mlp_kernel,
            out_shape=jax.ShapeDtypeStruct((N, C_out, HW), x_nchw.dtype),
            grid_spec=pltpu.PrefetchScalarGridSpec(
                num_scalar_prefetch=0,
                grid=grid,
                in_specs=in_specs,
                out_specs=out_specs,
            ),
            compiler_params=pltpu.CompilerParams(
                dimension_semantics=("parallel", "parallel"),
                vmem_limit_bytes=vmem_limit,
            ),
        )(x3d, w1, b1, w2, b2, w3, b3)

    if hasattr(pl, "Buffered"):
        try:
            out3d = run(True)
        except Exception:
            # pipeline_mode / single-buffering not supported by this JAX build:
            # fall back to default double-buffered specs (still correct).
            out3d = run(False)
    else:
        out3d = run(False)

    return out3d.reshape(N, C_out, H, W)


def init_params(key, in_f, hidden_dim, out_f, dtype=jnp.float32):
    """Weights stored as (out, in) == squeezed PyTorch Conv2d(out, in, 1, 1) weight;
    biases as (out, 1), kept f32 (added to the f32 accumulator).
    Kaiming-uniform-ish bounds matching nn.Conv2d's default (fan_in = in channels).
    dtype=jnp.bfloat16 is recommended on all generations (v5e/v6e/v7x): the MXU
    takes bf16 natively and it halves weight/activation HBM bytes; matmuls still
    accumulate in f32.  (For bf16 params, loosen the 1e-4 check in __main__ —
    intermediate activations are re-quantized to bf16 between layers.)"""
    ks = jax.random.split(key, 6)

    def uinit(k, shape, fan_in, dt):
        bound = 1.0 / float(fan_in) ** 0.5
        return jax.random.uniform(k, shape, jnp.float32, -bound, bound).astype(dt)

    w1 = uinit(ks[0], (hidden_dim, in_f), in_f, dtype)
    b1 = uinit(ks[1], (hidden_dim, 1), in_f, jnp.float32)
    w2 = uinit(ks[2], (hidden_dim, hidden_dim), hidden_dim, dtype)
    b2 = uinit(ks[3], (hidden_dim, 1), hidden_dim, jnp.float32)
    w3 = uinit(ks[4], (out_f, hidden_dim), hidden_dim, dtype)
    b3 = uinit(ks[5], (out_f, 1), hidden_dim, jnp.float32)
    return (w1, b1, w2, b2, w3, b3)


def reference_forward(x_nchw, params):
    """Pure-JAX reference of the PyTorch module for verification."""
    w1, b1, w2, b2, w3, b3 = params

    def conv1x1(w, b, t):
        y = jnp.einsum("oi,nihw->nohw", w.astype(jnp.float32), t.astype(jnp.float32))
        return y + b.reshape(1, -1, 1, 1)

    h = _leaky_relu(conv1x1(w1, b1, x_nchw))
    h = _leaky_relu(conv1x1(w2, b2, h))
    return conv1x1(w3, b3, h).astype(x_nchw.dtype)


if __name__ == "__main__":
    key = jax.random.PRNGKey(0)
    k_x, k_p = jax.random.split(key)

    # Small shapes consistent with the module: batch=2, in_f=4, hidden=32, out_f=8, spatial=16.
    N, in_f, hidden_dim, out_f, S = 2, 4, 32, 8, 16
    x = jax.random.normal(k_x, (N, in_f, S, S), dtype=jnp.float32)
    params = init_params(k_p, in_f, hidden_dim, out_f)

    out = jax.block_until_ready(conv2d1x1_forward(x, params))

    ref = reference_forward(x, params)
    assert out.shape == (N, out_f, S, S), out.shape
    err = float(jnp.max(jnp.abs(out.astype(jnp.float32) - ref.astype(jnp.float32))))
    assert err < 1e-4, err

    print("KERNEL_OK")
</pallas_src>

<mosaic_0001>
module attributes {stable_mosaic.version = 11 : i64} {
  func.func @conv1x1_mlp_kernel(%arg0: i32, %arg1: i32, %arg2: memref<1x4x256xf32, #tpu.memory_space<vmem>>, %arg3: memref<32x4xf32, #tpu.memory_space<vmem>>, %arg4: memref<32x1xf32, #tpu.memory_space<vmem>>, %arg5: memref<32x32xf32, #tpu.memory_space<vmem>>, %arg6: memref<32x1xf32, #tpu.memory_space<vmem>>, %arg7: memref<8x32xf32, #tpu.memory_space<vmem>>, %arg8: memref<8x1xf32, #tpu.memory_space<vmem>>, %arg9: memref<1x8x256xf32, #tpu.memory_space<vmem>>) attributes {dimension_semantics = [#tpu.dimension_semantics<parallel>, #tpu.dimension_semantics<parallel>], iteration_bounds = array<i64: 2, 1>, scalar_prefetch = 0 : i64, scratch_operands = 0 : i64, tpu.core_type = #tpu.core_type<tc>, window_params = [{transform_indices = @transform_0, window_bounds = array<i64: 1, 4, 256>}, {pipeline_mode = #tpu.pipeline_mode<synchronous>, transform_indices = @transform_1, window_bounds = array<i64: 32, 4>}, {pipeline_mode = #tpu.pipeline_mode<synchronous>, transform_indices = @transform_2, window_bounds = array<i64: 32, 1>}, {pipeline_mode = #tpu.pipeline_mode<synchronous>, transform_indices = @transform_3, window_bounds = array<i64: 32, 32>}, {pipeline_mode = #tpu.pipeline_mode<synchronous>, transform_indices = @transform_4, window_bounds = array<i64: 32, 1>}, {pipeline_mode = #tpu.pipeline_mode<synchronous>, transform_indices = @transform_5, window_bounds = array<i64: 8, 32>}, {pipeline_mode = #tpu.pipeline_mode<synchronous>, transform_indices = @transform_6, window_bounds = array<i64: 8, 1>}, {transform_indices = @transform_7, window_bounds = array<i64: 1, 8, 256>}]} {
    %c0 = arith.constant 0 : index
    %c0_0 = arith.constant 0 : index
    %c0_1 = arith.constant 0 : index
    %0 = vector.load %arg2[%c0, %c0_0, %c0_1] : memref<1x4x256xf32, #tpu.memory_space<vmem>>, vector<1x4x256xf32>
    %1 = vector.shape_cast %0 : vector<1x4x256xf32> to vector<4x256xf32>
    %c0_2 = arith.constant 0 : index
    %c0_3 = arith.constant 0 : index
    %2 = vector.load %arg3[%c0_2, %c0_3] : memref<32x4xf32, #tpu.memory_space<vmem>>, vector<32x4xf32>
    %cst = arith.constant dense<0.000000e+00> : vector<32x256xf32>
    %3 = tpu.matmul %2, %1, %cst {dimension_numbers = #tpu.dot_dimension_numbers<[1], [0], [0], [1], [0, 0, 1, 1], [], []>} : vector<32x4xf32>, vector<4x256xf32>, vector<32x256xf32> -> vector<32x256xf32>
    %c0_4 = arith.constant 0 : index
    %c0_5 = arith.constant 0 : index
    %4 = vector.load %arg4[%c0_4, %c0_5] : memref<32x1xf32, #tpu.memory_space<vmem>>, vector<32x1xf32>
    %5 = vector.broadcast %4 : vector<32x1xf32> to vector<32x256xf32>
    %6 = arith.addf %3, %5 : vector<32x256xf32>
    %cst_6 = arith.constant 0.000000e+00 : f32
    %7 = vector.broadcast %cst_6 : f32 to vector<32x256xf32>
    %8 = arith.cmpf ogt, %6, %7 : vector<32x256xf32>
    %cst_7 = arith.constant 0.00999999977 : f32
    %9 = vector.broadcast %cst_7 : f32 to vector<32x256xf32>
    %10 = arith.mulf %9, %6 : vector<32x256xf32>
    %11 = arith.select %8, %6, %10 : vector<32x256xi1>, vector<32x256xf32>
    %c0_8 = arith.constant 0 : index
    %c0_9 = arith.constant 0 : index
    %12 = vector.load %arg5[%c0_8, %c0_9] : memref<32x32xf32, #tpu.memory_space<vmem>>, vector<32x32xf32>
    %cst_10 = arith.constant dense<0.000000e+00> : vector<32x256xf32>
    %13 = tpu.matmul %12, %11, %cst_10 {dimension_numbers = #tpu.dot_dimension_numbers<[1], [0], [0], [1], [0, 0, 1, 1], [], []>} : vector<32x32xf32>, vector<32x256xf32>, vector<32x256xf32> -> vector<32x256xf32>
    %c0_11 = arith.constant 0 : index
    %c0_12 = arith.constant 0 : index
    %14 = vector.load %arg6[%c0_11, %c0_12] : memref<32x1xf32, #tpu.memory_space<vmem>>, vector<32x1xf32>
    %15 = vector.broadcast %14 : vector<32x1xf32> to vector<32x256xf32>
    %16 = arith.addf %13, %15 : vector<32x256xf32>
    %cst_13 = arith.constant 0.000000e+00 : f32
    %17 = vector.broadcast %cst_13 : f32 to vector<32x256xf32>
    %18 = arith.cmpf ogt, %16, %17 : vector<32x256xf32>
    %cst_14 = arith.constant 0.00999999977 : f32
    %19 = vector.broadcast %cst_14 : f32 to vector<32x256xf32>
    %20 = arith.mulf %19, %16 : vector<32x256xf32>
    %21 = arith.select %18, %16, %20 : vector<32x256xi1>, vector<32x256xf32>
    %c0_15 = arith.constant 0 : index
    %c0_16 = arith.constant 0 : index
    %22 = vector.load %arg7[%c0_15, %c0_16] : memref<8x32xf32, #tpu.memory_space<vmem>>, vector<8x32xf32>
    %cst_17 = arith.constant dense<0.000000e+00> : vector<8x256xf32>
    %23 = tpu.matmul %22, %21, %cst_17 {dimension_numbers = #tpu.dot_dimension_numbers<[1], [0], [0], [1], [0, 0, 1, 1], [], []>} : vector<8x32xf32>, vector<32x256xf32>, vector<8x256xf32> -> vector<8x256xf32>
    %c0_18 = arith.constant 0 : index
    %c0_19 = arith.constant 0 : index
    %24 = vector.load %arg8[%c0_18, %c0_19] : memref<8x1xf32, #tpu.memory_space<vmem>>, vector<8x1xf32>
    %25 = vector.broadcast %24 : vector<8x1xf32> to vector<8x256xf32>
    %26 = arith.addf %23, %25 : vector<8x256xf32>
    %c0_20 = arith.constant 0 : index
    %c0_21 = arith.constant 0 : index
    %c0_22 = arith.constant 0 : index
    %27 = vector.load %arg9[%c0_20, %c0_21, %c0_22] : memref<1x8x256xf32, #tpu.memory_space<vmem>>, vector<1x8x256xf32>
    %28 = vector.shape_cast %27 : vector<1x8x256xf32> to vector<8x256xf32>
    %29 = vector.shape_cast %26 : vector<8x256xf32> to vector<1x8x256xf32>
    tpu.vector_store %arg9[%c0_20, %c0_21, %c0_22], %29 {strides = array<i32>} : memref<1x8x256xf32, #tpu.memory_space<vmem>>, vector<1x8x256xf32>,
    return
  }
  func.func @transform_0(%arg0: i32, %arg1: i32) -> (i32, i32, i32) {
    %c0_i32 = arith.constant 0 : i32
    %c0_i32_0 = arith.constant 0 : i32
    return %arg0, %c0_i32, %arg1 : i32, i32, i32
  }
  func.func @transform_1(%arg0: i32, %arg1: i32) -> (i32, i32) {
    %c0_i32 = arith.constant 0 : i32
    %c0_i32_0 = arith.constant 0 : i32
    %c0_i32_1 = arith.constant 0 : i32
    return %c0_i32, %c0_i32_0 : i32, i32
  }
  func.func @transform_2(%arg0: i32, %arg1: i32) -> (i32, i32) {
    %c0_i32 = arith.constant 0 : i32
    %c0_i32_0 = arith.constant 0 : i32
    %c0_i32_1 = arith.constant 0 : i32
    return %c0_i32, %c0_i32_0 : i32, i32
  }
  func.func @transform_3(%arg0: i32, %arg1: i32) -> (i32, i32) {
    %c0_i32 = arith.constant 0 : i32
    %c0_i32_0 = arith.constant 0 : i32
    %c0_i32_1 = arith.constant 0 : i32
    return %c0_i32, %c0_i32_0 : i32, i32
  }
  func.func @transform_4(%arg0: i32, %arg1: i32) -> (i32, i32) {
    %c0_i32 = arith.constant 0 : i32
    %c0_i32_0 = arith.constant 0 : i32
    %c0_i32_1 = arith.constant 0 : i32
    return %c0_i32, %c0_i32_0 : i32, i32
  }
  func.func @transform_5(%arg0: i32, %arg1: i32) -> (i32, i32) {
    %c0_i32 = arith.constant 0 : i32
    %c0_i32_0 = arith.constant 0 : i32
    %c0_i32_1 = arith.constant 0 : i32
    return %c0_i32, %c0_i32_0 : i32, i32
  }
  func.func @transform_6(%arg0: i32, %arg1: i32) -> (i32, i32) {
    %c0_i32 = arith.constant 0 : i32
    %c0_i32_0 = arith.constant 0 : i32
    %c0_i32_1 = arith.constant 0 : i32
    return %c0_i32, %c0_i32_0 : i32, i32
  }
  func.func @transform_7(%arg0: i32, %arg1: i32) -> (i32, i32, i32) {
    %c0_i32 = arith.constant 0 : i32
    %c0_i32_0 = arith.constant 0 : i32
    return %arg0, %c0_i32, %arg1 : i32, i32, i32
  }
}

module attributes {stable_mosaic.version = 11 : i64} {
  func.func @conv1x1_mlp_kernel(%arg0: i32, %arg1: i32, %arg2: memref<1x4x256xf32, #tpu.memory_space<vmem>>, %arg3: memref<32x4xf32, #tpu.memory_space<vmem>>, %arg4: memref<32x1xf32, #tpu.memory_space<vmem>>, %arg5: memref<32x32xf32, #tpu.memory_space<vmem>>, %arg6: memref<32x1xf32, #tpu.memory_space<vmem>>, %arg7: memref<8x32xf32, #tpu.memory_space<vmem>>, %arg8: memref<8x1xf32, #tpu.memory_space<vmem>>, %arg9: memref<1x8x256xf32, #tpu.memory_space<vmem>>) attributes {dimension_semantics = [#tpu.dimension_semantics<parallel>, #tpu.dimension_semantics<parallel>], iteration_bounds = array<i64: 2, 1>, scalar_prefetch = 0 : i64, scratch_operands = 0 : i64, tpu.core_type = #tpu.core_type<tc>, window_params = [{transform_indices = @transform_0, window_bounds = array<i64: 1, 4, 256>}, {pipeline_mode = #tpu.pipeline_mode<synchronous>, transform_indices = @transform_1, window_bounds = array<i64: 32, 4>}, {pipeline_mode = #tpu.pipeline_mode<synchronous>, transform_indices = @transform_2, window_bounds = array<i64: 32, 1>}, {pipeline_mode = #tpu.pipeline_mode<synchronous>, transform_indices = @transform_3, window_bounds = array<i64: 32, 32>}, {pipeline_mode = #tpu.pipeline_mode<synchronous>, transform_indices = @transform_4, window_bounds = array<i64: 32, 1>}, {pipeline_mode = #tpu.pipeline_mode<synchronous>, transform_indices = @transform_5, window_bounds = array<i64: 8, 32>}, {pipeline_mode = #tpu.pipeline_mode<synchronous>, transform_indices = @transform_6, window_bounds = array<i64: 8, 1>}, {transform_indices = @transform_7, window_bounds = array<i64: 1, 8, 256>}]} {
    %c0 = arith.constant 0 : index
    %c0_0 = arith.constant 0 : index
    %c0_1 = arith.constant 0 : index
    %0 = vector.load %arg2[%c0, %c0_0, %c0_1] : memref<1x4x256xf32, #tpu.memory_space<vmem>>, vector<1x4x256xf32>
    %1 = vector.shape_cast %0 : vector<1x4x256xf32> to vector<4x256xf32>
    %c0_2 = arith.constant 0 : index
    %c0_3 = arith.constant 0 : index
    %2 = vector.load %arg3[%c0_2, %c0_3] : memref<32x4xf32, #tpu.memory_space<vmem>>, vector<32x4xf32>
    %cst = arith.constant dense<0.000000e+00> : vector<32x256xf32>
    %3 = tpu.matmul %2, %1, %cst {dimension_numbers = #tpu.dot_dimension_numbers<[1], [0], [0], [1], [0, 0, 1, 1], [], []>} : vector<32x4xf32>, vector<4x256xf32>, vector<32x256xf32> -> vector<32x256xf32>
    %c0_4 = arith.constant 0 : index
    %c0_5 = arith.constant 0 : index
    %4 = vector.load %arg4[%c0_4, %c0_5] : memref<32x1xf32, #tpu.memory_space<vmem>>, vector<32x1xf32>
    %5 = vector.broadcast %4 : vector<32x1xf32> to vector<32x256xf32>
    %6 = arith.addf %3, %5 : vector<32x256xf32>
    %cst_6 = arith.constant 0.000000e+00 : f32
    %7 = vector.broadcast %cst_6 : f32 to vector<32x256xf32>
    %8 = arith.cmpf ogt, %6, %7 : vector<32x256xf32>
    %cst_7 = arith.constant 0.00999999977 : f32
    %9 = vector.broadcast %cst_7 : f32 to vector<32x256xf32>
    %10 = arith.mulf %9, %6 : vector<32x256xf32>
    %11 = arith.select %8, %6, %10 : vector<32x256xi1>, vector<32x256xf32>
    %c0_8 = arith.constant 0 : index
    %c0_9 = arith.constant 0 : index
    %12 = vector.load %arg5[%c0_8, %c0_9] : memref<32x32xf32, #tpu.memory_space<vmem>>, vector<32x32xf32>
    %cst_10 = arith.constant dense<0.000000e+00> : vector<32x256xf32>
    %13 = tpu.matmul %12, %11, %cst_10 {dimension_numbers = #tpu.dot_dimension_numbers<[1], [0], [0], [1], [0, 0, 1, 1], [], []>} : vector<32x32xf32>, vector<32x256xf32>, vector<32x256xf32> -> vector<32x256xf32>
    %c0_11 = arith.constant 0 : index
    %c0_12 = arith.constant 0 : index
    %14 = vector.load %arg6[%c0_11, %c0_12] : memref<32x1xf32, #tpu.memory_space<vmem>>, vector<32x1xf32>
    %15 = vector.broadcast %14 : vector<32x1xf32> to vector<32x256xf32>
    %16 = arith.addf %13, %15 : vector<32x256xf32>
    %cst_13 = arith.constant 0.000000e+00 : f32
    %17 = vector.broadcast %cst_13 : f32 to vector<32x256xf32>
    %18 = arith.cmpf ogt, %16, %17 : vector<32x256xf32>
    %cst_14 = arith.constant 0.00999999977 : f32
    %19 = vector.broadcast %cst_14 : f32 to vector<32x256xf32>
    %20 = arith.mulf %19, %16 : vector<32x256xf32>
    %21 = arith.select %18, %16, %20 : vector<32x256xi1>, vector<32x256xf32>
    %c0_15 = arith.constant 0 : index
    %c0_16 = arith.constant 0 : index
    %22 = vector.load %arg7[%c0_15, %c0_16] : memref<8x32xf32, #tpu.memory_space<vmem>>, vector<8x32xf32>
    %cst_17 = arith.constant dense<0.000000e+00> : vector<8x256xf32>
    %23 = tpu.matmul %22, %21, %cst_17 {dimension_numbers = #tpu.dot_dimension_numbers<[1], [0], [0], [1], [0, 0, 1, 1], [], []>} : vector<8x32xf32>, vector<32x256xf32>, vector<8x256xf32> -> vector<8x256xf32>
    %c0_18 = arith.constant 0 : index
    %c0_19 = arith.constant 0 : index
    %24 = vector.load %arg8[%c0_18, %c0_19] : memref<8x1xf32, #tpu.memory_space<vmem>>, vector<8x1xf32>
    %25 = vector.broadcast %24 : vector<8x1xf32> to vector<8x256xf32>
    %26 = arith.addf %23, %25 : vector<8x256xf32>
    %c0_20 = arith.constant 0 : index
    %c0_21 = arith.constant 0 : index
    %c0_22 = arith.constant 0 : index
    %27 = vector.load %arg9[%c0_20, %c0_21, %c0_22] : memref<1x8x256xf32, #tpu.memory_space<vmem>>, vector<1x8x256xf32>
    %28 = vector.shape_cast %27 : vector<1x8x256xf32> to vector<8x256xf32>
    %29 = vector.shape_cast %26 : vector<8x256xf32> to vector<1x8x256xf32>
    tpu.vector_store %arg9[%c0_20, %c0_21, %c0_22], %29 {strides = array<i32>} : memref<1x8x256xf32, #tpu.memory_space<vmem>>, vector<1x8x256xf32>,
    return
  }
  func.func @transform_0(%arg0: i32, %arg1: i32) -> (i32, i32, i32) {
    %c0_i32 = arith.constant 0 : i32
    %c0_i32_0 = arith.constant 0 : i32
    return %arg0, %c0_i32, %arg1 : i32, i32, i32
  }
  func.func @transform_1(%arg0: i32, %arg1: i32) -> (i32, i32) {
    %c0_i32 = arith.constant 0 : i32
    %c0_i32_0 = arith.constant 0 : i32
    %c0_i32_1 = arith.constant 0 : i32
    return %c0_i32, %c0_i32_0 : i32, i32
  }
  func.func @transform_2(%arg0: i32, %arg1: i32) -> (i32, i32) {
    %c0_i32 = arith.constant 0 : i32
    %c0_i32_0 = arith.constant 0 : i32
    %c0_i32_1 = arith.constant 0 : i32
    return %c0_i32, %c0_i32_0 : i32, i32
  }
  func.func @transform_3(%arg0: i32, %arg1: i32) -> (i32, i32) {
    %c0_i32 = arith.constant 0 : i32
    %c0_i32_0 = arith.constant 0 : i32
    %c0_i32_1 = arith.constant 0 : i32
    return %c0_i32, %c0_i32_0 : i32, i32
  }
  func.func @transform_4(%arg0: i32, %arg1: i32) -> (i32, i32) {
    %c0_i32 = arith.constant 0 : i32
    %c0_i32_0 = arith.constant 0 : i32
    %c0_i32_1 = arith.constant 0 : i32
    return %c0_i32, %c0_i32_0 : i32, i32
  }
  func.func @transform_5(%arg0: i32, %arg1: i32) -> (i32, i32) {
    %c0_i32 = arith.constant 0 : i32
    %c0_i32_0 = arith.constant 0 : i32
    %c0_i32_1 = arith.constant 0 : i32
    return %c0_i32, %c0_i32_0 : i32, i32
  }
  func.func @transform_6(%arg0: i32, %arg1: i32) -> (i32, i32) {
    %c0_i32 = arith.constant 0 : i32
    %c0_i32_0 = arith.constant 0 : i32
    %c0_i32_1 = arith.constant 0 : i32
    return %c0_i32, %c0_i32_0 : i32, i32
  }
  func.func @transform_7(%arg0: i32, %arg1: i32) -> (i32, i32, i32) {
    %c0_i32 = arith.constant 0 : i32
    %c0_i32_0 = arith.constant 0 : i32
    return %arg0, %c0_i32, %arg1 : i32, i32, i32
  }
}

</mosaic_0001>

<bundles_post_ra>
// kernel: tpu_custom_call.1
= control target key start
LH: loop header
LB: loop body
LE: loop exit
PB: predicated region body
PF: predicated region fallthrough
CT: control target
= control target key end

     0   :  { %12 = vsyncpa [#allocation3], 0  ;;  %s1178_s0 = inlined_call_operand.vmem [shape: f32[2,4,256], index: 0, kind: input, shape index: {}]   ;;  %s1179_s1 = inlined_call_operand.vmem [shape: f32[32,4], index: 1, kind: input, shape index: {}]   ;;  %s1180_s2 = inlined_call_operand.vmem [shape: f32[32,1], index: 2, kind: input, shape index: {}]   ;;  %s1181_s3 = inlined_call_operand.vmem [shape: f32[32,32], index: 3, kind: input, shape index: {}]   ;;  %s1182_s4 = inlined_call_operand.vmem [shape: f32[32,1], index: 4, kind: input, shape index: {}]   ;;  %s1183_s5 = inlined_call_operand.vmem [shape: f32[8,32], index: 5, kind: input, shape index: {}]   ;;  %s1184_s6 = inlined_call_operand.vmem [shape: f32[8,1], index: 6, kind: input, shape index: {}]   ;;  %s1185_s7 = inlined_call_operand.hbm [shape: f32[2,8,256], index: 7, kind: output, shape index: {}]  }
   0x1   :  { %14 = vsyncpa [#allocation3 + $0x1], 0  ;;  %s1007_s24 = smov 0   ;;  %s1009_s25 = smov 0  }
   0x2   :  { %s1011_s26 = smov 0   ;;  %s1013_s27 = smov 0  }
   0x3   :  { %s1015_s28 = smov 0   ;;  %s1017_s29 = smov 0  }
   0x4 LB: > { %s800_s30 = sadd.s32 4294967295, %s962_s29   ;;  %s801_s8 = sadd.s32 4294967294, %s962_s29   ;;  %s962_s29 = sphi %s1017_s29, %s20_s29   ;;  %s958_s28 = sphi %s1015_s28, %s1192_s28   ;;  %s954_s27 = sphi %s1013_s27, %s1191_s27   ;;  %s950_s26 = sphi %s1011_s26, %s1190_s26   ;;  %s946_s25 = sphi %s1009_s25, %s1189_s25   ;;  %s942_s24 = sphi %s1007_s24, %s1188_s24  }
   0x5   : > { %s32_s9 = sadd.s32 1, %s958_s28  ;;  %s195_s10 = sadd.s32 1, %s950_s26 }
   0x6   : > { %p34_p0 = scmp.ge.s32.totalorder %s32_s9, 2  ;;  %p205_p1 = scmp.ne.s32.totalorder %s950_s26, %s946_s25 }
   0x7   : > { %p206_p2 = scmp.eq.s32.totalorder %s800_s30, 1  ;;  %p211_p3 = scmp.ne.s32.totalorder %s946_s25, %s942_s24 }
   0x8   : > { %s1194_s9 = smov (%p34_p0, %s32_s9), 0  ;;  %p212_p5 = scmp.eq.s32.totalorder %s801_s8, 1 }
   0x9   : > { %p1047_p4 = por %p206_p2, %p205_p1  ;;  %s190_s12 = ssub.s32 %s958_s28, %s1194_s9 }
   0xa   : > { %p804_p6 = scmp.ge.s32.totalorder %s962_s29, 1  ;;  %p193_p7 = scmp.eq.s32.totalorder %s190_s12, 0 }
   0xb   : > { %p1054_p8 = por %p212_p5, %p211_p3  ;;  %p261_p9 = scmp.lt.s32.totalorder %s962_s29, 3 }
   0xc   : > { %s1060_s14 = scalar_select %p193_p7, %s950_s26, %s195_s10  }
   0xd   : > { %p262_p10 = pnand %p804_p6, %p261_p9 }
   0xe   : > { %p298_p11 = scmp.lt.s32.totalorder (!%p262_p10), %s954_s27, 1  ;;  %s825_s19 = sshll.u32 (!%p262_p10), %s954_s27, 8 }
   0xf   : > { %265 = sbr.rel (%p262_p10) target bundleno = 680 (0x2a8), region = 48  ;;  %s722_s30 = scalar_lea.hbm (!%p262_p10), %s1185_s7, %s825_s19 }
  0x14   : > { %v964_v0 = vmov 0.0   ;;  %v316_v1 = vld [vmem:[%s1180_s2 + $0x18] sm:$0xff]  ;;  %s299_s17 = scalar_select %p298_p11, %s954_s27, 1  ;;  %v965_v2 = vmov 0   ;;  %v314_v3 = vld [vmem:[%s1180_s2 + $0x8] sm:$0xff]  ;;  %v315_v4 = vld [vmem:[%s1180_s2 + $0x10] sm:$0xff] }
  0x15   : > { %421 = vmatprep.mubr.f32.mxu0 %v964_v0  ;;  %575 = vmatprep.mubr.f32.mxu1 %v964_v0  ;;  %v313_v5 = vld [vmem:[%s1180_s2] sm:$0xff]  ;;  %vm352_vm0 = vcmask 1043456   ;;  %vm339_vm1 = vcmask 31744   ;;  %v477_v9 = vld [vmem:[%s1182_s4 + $0x18] sm:$0xff]  ;;  %v476_v10 = vld [vmem:[%s1182_s4 + $0x10] sm:$0xff]  ;;  %vm498_vm10 = vcmask 261120  }
  0x16   : > { %884 = vset.pattern.permute.xlu1 %v965_v2  ;;  %883 = vset.pattern.permute.xlu0 %v965_v2  ;;  %s824_s20 = sshll.u32 %s299_s17, 3  ;;  %v309_v8 = vld [vmem:[%s1179_s1] sm:$0xff]  ;;  %v310_v11 = vld [vmem:[%s1179_s1 + $0x8] sm:$0xff]  ;;  %v311_v14 = vld [vmem:[%s1179_s1 + $0x10] sm:$0xff]  ;;  %s294_s17 = sand.u32 1, %s946_s25  }
  0x17   : > { %334 = vperm.xlu0 %883, %v316_v1   ;;  %324 = vperm.xlu1 %884, %v314_v3   ;;  %s305_s12 = scalar_lea.vmem %s1178_s0, %s824_s20  ;;  %v475_v12 = vld [vmem:[%s1182_s4 + $0x8] sm:$0xff]  ;;  %v474_v13 = vld [vmem:[%s1182_s4] sm:$0xff]  ;;  %v312_v16 = vld [vmem:[%s1179_s1 + $0x18] sm:$0xff]  ;;  %s805_s18 = sshll.u32 %s294_s17, 4 }
  0x18   : > { %v308_v6 = vld [vmem:[%s305_s12] sm:$0xff]  ;;  %v471_v54 = vld [vmem:[%s1181_s3 + $0x8] sm:$0xff]  ;;  %v472_v55 = vld [vmem:[%s1181_s3 + $0x10] sm:$0xff]  ;;  %s296_s21 = scalar_lea.vmem [#allocation2], %s805_s18  ;;  %s708_s8 = scalar_lea.sflag [#allocation3], %s294_s17 }
  0x19   : > { %v338_v7 = vcombine.high %v308_v6, %v308_v6  ;;  %v625_v15 = vld [vmem:[%s1184_s6] sm:$0xff]  ;;  %v473_v56 = vld [vmem:[%s1181_s3 + $0x18] sm:$0xff]  ;;  %s724_s20 = sshll.u32 %s296_s21, 4  ;;  %s966_s12 = smov [#allocation2]   ;;  %s725_s20 = int_to_ptr.vmem [resolvable:$true] %s724_s20 }
  0x1a   : > { %v470_v52 = vld [vmem:[%s1181_s3] sm:$0xff]  ;;  %s886_s10 = scalar_lea.vmem %s725_s20, 256  ;;  %s890_s27 = sshll.u32 %s966_s12, 4  ;;  %s891_s27 = int_to_ptr.vmem [resolvable:$false] %s890_s27 }
  0x1b   : > { %329 = vperm.xlu0 %883, %v315_v4   ;;  %319 = vperm.xlu1 %884, %v313_v5   ;;  %p887_p12 = scmp.ne.s32.totalorder %s725_s20, %s886_s10  ;;  %s892_s15 = scalar_lea.vmem %s891_s27, 512 }
  0x1c   : > { %808 = vmatprep.subr.msk.mxu0 %vm352_vm0, %v338_v7  ;;  %p893_p1 = scmp.lt.s32.totalorder %s725_s20, %s891_s27  ;;  %p894_p2 = scmp.lt.s32.totalorder %s892_s15, %s886_s10 }
  0x1d   : > { %809 = vmatpush1.msk.msra.mxu0 %vm352_vm0, %v308_v6  ;;  %p888_p13 = pnand %p887_p12, %p1047_p4 }
  0x1e   : > { %810 = vmatmul.mubr.msk.f32.vlgmr.msra.gmra.mxu0 %vm339_vm1, %v309_v8  ;;  %p895_p3 = por %p894_p2, %p893_p1 }
  0x1f   : > { %495 = vperm.xlu0 %883, %v477_v9   ;;  %427 = vmatprep.mubr.f32.mxu0 %v964_v0  ;;  %p889_p0 = pneg %p888_p13 }
  0x20   : > { %490 = vperm.xlu1 %884, %v476_v10  }
  0x21   : > { %p896_p5 = pnand %p895_p3, %p889_p0 }
  0x22   : > { %811 = vmatmul.mubr.msk.f32.gmra.mxu0 %vm339_vm1, %v310_v11 }
  0x23   : > { %485 = vperm.xlu0 %883, %v475_v12   ;;  %433 = vmatprep.mubr.f32.mxu0 %v964_v0 }
  0x24   : > { %480 = vperm.xlu1 %884, %v474_v13  }
  0x26   : > { %812 = vmatmul.mubr.msk.f32.gmra.mxu0 %vm339_vm1, %v311_v14 }
  0x27   : > { %628 = vperm.xlu0 %883, %v625_v15   ;;  %439 = vmatprep.mubr.f32.mxu0 %v964_v0 }
  0x2a   : > { %813 = vmatmul.mubr.msk.f32.gmra.mxu0 %vm339_vm1, %v312_v16 }
  0x2b   : > { %698 = vmatprep.mubr.f32.mxu0 %v964_v0 }
  0x92   : > { %v335_v20 = vpop.permute.xlu0 %334  ;;  %v325_v23 = vpop.permute.xlu1 %324 }
  0x96   : > { %v330_v25 = vpop.permute.xlu0 %329  ;;  %v320_v31 = vpop.permute.xlu1 %319 }
  0x9a   : > { %v496_v61 = vpop.permute.xlu0 %495 }
  0x9b   : > { %v491_v63 = vpop.permute.xlu1 %490 }
  0x9e   : > { %v486_v5 = vpop.permute.xlu0 %485 }
  0x9f   : > { %v481_v7 = vpop.permute.xlu1 %480 }
  0xde   : > { %v423_v17 = vpop.f32.mrf.mxu0 }
  0xdf   : > { %v424_v39 = vadd.f32 %v423_v17, %v320_v31 }
  0xe0   : > { %v425_v18 = vpop.f32.mrf.mxu0 }
  0xe1   : > { %v426_v34 = vadd.f32 %v425_v18, %v320_v31  ;;  %v454_v47 = vmul.f32 0.01, %v424_v39  ;;  %vm446_vm9 = vcmp.gt.f32.partialorder %v424_v39, 0.0 }
  0xe2   : > { %v429_v19 = vpop.f32.mrf.mxu0 }
  0xe3   : > { %v430_v35 = vadd.f32 %v429_v19, %v325_v23  ;;  %v455_v45 = vmul.f32 0.01, %v426_v34  ;;  %vm447_vm8 = vcmp.gt.f32.partialorder %v426_v34, 0.0  ;;  %v462_v53 = vsel %vm446_vm9, %v424_v39, %v454_v47 }
  0xe4   : > { %v431_v21 = vpop.f32.mrf.mxu0 }
  0xe5   : > { %v432_v32 = vadd.f32 %v431_v21, %v325_v23  ;;  %v456_v43 = vmul.f32 0.01, %v430_v35  ;;  %vm448_vm7 = vcmp.gt.f32.partialorder %v430_v35, 0.0  ;;  %v463_v51 = vsel %vm447_vm8, %v426_v34, %v455_v45 }
  0xe6   : > { %v435_v22 = vpop.f32.mrf.mxu0 }
  0xe7   : > { %v436_v29 = vadd.f32 %v435_v22, %v330_v25  ;;  %v457_v41 = vmul.f32 0.01, %v432_v32  ;;  %vm449_vm6 = vcmp.gt.f32.partialorder %v432_v32, 0.0  ;;  %v464_v50 = vsel %vm448_vm7, %v430_v35, %v456_v43 }
  0xe8   : > { %v437_v24 = vpop.f32.mrf.mxu0 }
  0xe9   : > { %v438_v27 = vadd.f32 %v437_v24, %v330_v25  ;;  %v458_v40 = vmul.f32 0.01, %v436_v29  ;;  %vm450_vm5 = vcmp.gt.f32.partialorder %v436_v29, 0.0  ;;  %v465_v49 = vsel %vm449_vm6, %v432_v32, %v457_v41 }
  0xea   : > { %v441_v26 = vpop.f32.mrf.mxu0 }
  0xeb   : > { %v442_v28 = vadd.f32 %v441_v26, %v335_v20  ;;  %v459_v37 = vmul.f32 0.01, %v438_v27  ;;  %vm451_vm4 = vcmp.gt.f32.partialorder %v438_v27, 0.0  ;;  %v466_v48 = vsel %vm450_vm5, %v436_v29, %v458_v40 }
  0xec   : > { %v443_v30 = vpop.f32.mrf.mxu0 }
  0xed   : > { %v444_v33 = vadd.f32 %v443_v30, %v335_v20  ;;  %v460_v36 = vmul.f32 0.01, %v442_v28  ;;  %vm452_vm3 = vcmp.gt.f32.partialorder %v442_v28, 0.0  ;;  %v467_v46 = vsel %vm451_vm4, %v438_v27, %v459_v37  ;;  %v629_v30 = vpop.permute.xlu0 %628 }
  0xef   : > { %vm453_vm2 = vcmp.gt.f32.partialorder %v444_v33, 0.0  ;;  %v461_v38 = vmul.f32 0.01, %v444_v33  ;;  %v468_v44 = vsel %vm452_vm3, %v442_v28, %v460_v36  ;;  %v624_v28 = vld [vmem:[%s1183_s5] sm:$0xff] }
  0xf1   : > { %v469_v42 = vsel %vm453_vm2, %v444_v33, %v461_v38 }
  0xf2   : > { %535 = vmatprep.subr.mxu1 %v469_v42 }
  0xf3   : > { %536 = vmatpush1.msra.mxu1 %v468_v44 }
  0xf4   : > { %537 = vmatprep.subr.mxu1 %v467_v46 }
  0xf5   : > { %538 = vmatpush1.msra.mxu1 %v466_v48 }
  0xf6   : > { %539 = vmatprep.subr.mxu1 %v465_v49 }
  0xf7   : > { %540 = vmatpush1.msra.mxu1 %v464_v50 }
  0xf8   : > { %541 = vmatprep.subr.mxu1 %v463_v51 }
  0xf9   : > { %542 = vmatpush1.msra.mxu1 %v462_v53 }
  0xfa   : > { %814 = vmatmul.mubr.msk.f32.vlgmr.msra.gmra.mxu1 %vm498_vm10, %v470_v52 }
  0xfb   : > { %581 = vmatprep.mubr.f32.mxu1 %v964_v0 }
  0xfe   : > { %815 = vmatmul.mubr.msk.f32.gmra.mxu1 %vm498_vm10, %v471_v54 }
  0xff   : > { %587 = vmatprep.mubr.f32.mxu1 %v964_v0 }
 0x102   : > { %816 = vmatmul.mubr.msk.f32.gmra.mxu1 %vm498_vm10, %v472_v55 }
 0x103   : > { %593 = vmatprep.mubr.f32.mxu1 %v964_v0 }
 0x106   : > { %817 = vmatmul.mubr.msk.f32.gmra.mxu1 %vm498_vm10, %v473_v56 }
 0x1ba   : > { %v577_v57 = vpop.f32.mrf.mxu1 }
 0x1bb   : > { %v578_v15 = vadd.f32 %v577_v57, %v481_v7 }
 0x1bc   : > { %v579_v58 = vpop.f32.mrf.mxu1 }
 0x1bd   : > { %v580_v10 = vadd.f32 %v579_v58, %v481_v7  ;;  %v608_v23 = vmul.f32 0.01, %v578_v15  ;;  %vm600_vm2 = vcmp.gt.f32.partialorder %v578_v15, 0.0 }
 0x1be   : > { %v583_v59 = vpop.f32.mrf.mxu1 }
 0x1bf   : > { %v584_v11 = vadd.f32 %v583_v59, %v486_v5  ;;  %v609_v21 = vmul.f32 0.01, %v580_v10  ;;  %vm601_vm1 = vcmp.gt.f32.partialorder %v580_v10, 0.0  ;;  %v616_v29 = vsel %vm600_vm2, %v578_v15, %v608_v23 }
 0x1c0   : > { %v585_v60 = vpop.f32.mrf.mxu1 }
 0x1c1   : > { %v586_v8 = vadd.f32 %v585_v60, %v486_v5  ;;  %v610_v19 = vmul.f32 0.01, %v584_v11  ;;  %vm602_vm0 = vcmp.gt.f32.partialorder %v584_v11, 0.0  ;;  %v617_v27 = vsel %vm601_vm1, %v580_v10, %v609_v21 }
 0x1c2   : > { %v589_v62 = vpop.f32.mrf.mxu1 }
 0x1c3   : > { %v590_v6 = vadd.f32 %v589_v62, %v491_v63  ;;  %v611_v17 = vmul.f32 0.01, %v586_v8  ;;  %vm603_vm15 = vcmp.gt.f32.partialorder %v586_v8, 0.0  ;;  %v618_v26 = vsel %vm602_vm0, %v584_v11, %v610_v19 }
 0x1c4   : > { %v591_v1 = vpop.f32.mrf.mxu1 }
 0x1c5   : > { %v592_v3 = vadd.f32 %v591_v1, %v491_v63  ;;  %v612_v16 = vmul.f32 0.01, %v590_v6  ;;  %vm604_vm14 = vcmp.gt.f32.partialorder %v590_v6, 0.0  ;;  %v619_v25 = vsel %vm603_vm15, %v586_v8, %v611_v17 }
 0x1c6   : > { %v595_v2 = vpop.f32.mrf.mxu1 }
 0x1c7   : > { %v596_v4 = vadd.f32 %v595_v2, %v496_v61  ;;  %v613_v13 = vmul.f32 0.01, %v592_v3  ;;  %vm605_vm13 = vcmp.gt.f32.partialorder %v592_v3, 0.0  ;;  %v620_v24 = vsel %vm604_vm14, %v590_v6, %v612_v16 }
 0x1c8   : > { %v597_v0 = vpop.f32.mrf.mxu1 }
 0x1c9   : > { %v598_v9 = vadd.f32 %v597_v0, %v496_v61  ;;  %v614_v12 = vmul.f32 0.01, %v596_v4  ;;  %vm606_vm11 = vcmp.gt.f32.partialorder %v596_v4, 0.0  ;;  %v621_v22 = vsel %vm605_vm13, %v592_v3, %v613_v13 }
 0x1cb   : > { %v615_v14 = vmul.f32 0.01, %v598_v9  ;;  %vm607_vm12 = vcmp.gt.f32.partialorder %v598_v9, 0.0  ;;  %v622_v20 = vsel %vm606_vm11, %v596_v4, %v614_v12 }
 0x1cd   : > { %v623_v18 = vsel %vm607_vm12, %v598_v9, %v615_v14 }
 0x1ce   : > { %658 = vmatprep.subr.mxu0 %v623_v18 }
 0x1cf   : > { %659 = vmatpush1.msra.mxu0 %v622_v20 }
 0x1d0   : > { %660 = vmatprep.subr.mxu0 %v621_v22 }
 0x1d1   : > { %661 = vmatpush1.msra.mxu0 %v620_v24 }
 0x1d2   : > { %662 = vmatprep.subr.mxu0 %v619_v25 }
 0x1d3   : > { %663 = vmatpush1.msra.mxu0 %v618_v26 }
 0x1d4   : > { %664 = vmatprep.subr.mxu0 %v617_v27 }
 0x1d5   : > { %665 = vmatpush1.msra.mxu0 %v616_v29 }
 0x1d6   : > { %818 = vmatmul.mubr.msk.f32.vlgmr.msra.gmra.mxu0 %vm498_vm10, %v624_v28 }
 0x296   : > { %v700_v31 = vpop.f32.mrf.mxu0 }
 0x297   : > { %v701_v32 = vadd.f32 %v700_v31, %v629_v30 }
 0x298   : > { %v702_v33 = vpop.f32.mrf.mxu0 }
 0x299   : > { %705 = vst [vmem:[%s296_s21] sm:$0xff] %v701_v32  ;;  %v703_v34 = vadd.f32 %v702_v33, %v629_v30 }
 0x29b   : > { %706 = vst [vmem:[%s296_s21 + $0x8] sm:$0xff] %v703_v34 }
 0x29c   : > { %899 = shalt.err (!%p896_p5)
}
 0x29d   : > { %s900_s16 = scalar_lea.hbm %s722_s30, 256  ;;  %s904_s19 = scalar_lea.hbm %s1185_s7, 512 }
 0x29e   : > { %p901_p6 = scmp.ne.s32.totalorder %s722_s30, %s900_s16  ;;  %p905_p10 = scmp.lt.s32.totalorder %s722_s30, %s1185_s7 }
 0x29f   : > { %p906_p11 = scmp.lt.s32.totalorder %s904_s19, %s900_s16 }
 0x2a0   : > { %p902_p7 = pnand %p901_p6, %p1047_p4 }
 0x2a1   : > { %p907_p12 = por %p906_p11, %p905_p10 }
 0x2a2   : > { %p903_p9 = pneg %p902_p7 }
 0x2a4   : > { %p908_p13 = pnand %p907_p12, %p903_p9 }
 0x2a6   : > { %911 = shalt.err (!%p908_p13)
}
 0x2a7   : > { %826 = dma.vmem_to_hbm [thread:$0]  (%p1047_p4), %s725_s20, 256, %s722_s30, %s708_s8  }
 0x2a8 PF: > { %p832_p0 = scmp.ge.s32.totalorder %s962_s29, 2  ;;  %s736_s23 = sand.u32 1, %s942_s24  }
 0x2a9   : > { %s737_s10 = scalar_lea.sflag [#allocation3], %s736_s23 }
 0x2aa   : > { %p829_p1 = pnand %p832_p0, %p1054_p8 }
 0x2ac   : > { %p830_p2 = pneg %p829_p1 }
 0x2ae   : > { %937 = dma.done.wait (%p830_p2), %s737_s10, 256  }
 0x2af   : > { %939 = vsyncadd (%p830_p2), %s737_s10, 4294967040  ;;  %s20_s29 = sadd.s32 1, %s962_s29   ;;  %s1188_s24 = smov %s946_s25 }
 0x2b0   : > { %p17_p3 = scmp.ge.s32.totalorder %s20_s29, 4   ;;  %s1189_s25 = smov %s950_s26 }
 0x2b1   : > { %s1190_s26 = smov %s1060_s14  ;;  %s1191_s27 = smov %s958_s28 }
 0x2b2   : > { %s1192_s28 = smov %s1194_s9  ;;  %19 = sbr.rel (!%p17_p3) target bundleno = 4 (0x4), region = 83 }
 0x2b7   :  { %742 = vsyncpa [#allocation3], 1 }
 0x2b8   :  { %744 = vsyncpa [#allocation3 + $0x1], 1 }

// kernel: tpu_custom_call.1
= control target key start
LH: loop header
LB: loop body
LE: loop exit
PB: predicated region body
PF: predicated region fallthrough
CT: control target
= control target key end

     0   :  { %12 = vsyncpa [#allocation3], 0  ;;  %s1178_s0 = inlined_call_operand.vmem [shape: f32[2,4,256], index: 0, kind: input, shape index: {}]   ;;  %s1179_s1 = inlined_call_operand.vmem [shape: f32[32,4], index: 1, kind: input, shape index: {}]   ;;  %s1180_s2 = inlined_call_operand.vmem [shape: f32[32,1], index: 2, kind: input, shape index: {}]   ;;  %s1181_s3 = inlined_call_operand.vmem [shape: f32[32,32], index: 3, kind: input, shape index: {}]   ;;  %s1182_s4 = inlined_call_operand.vmem [shape: f32[32,1], index: 4, kind: input, shape index: {}]   ;;  %s1183_s5 = inlined_call_operand.vmem [shape: f32[8,32], index: 5, kind: input, shape index: {}]   ;;  %s1184_s6 = inlined_call_operand.vmem [shape: f32[8,1], index: 6, kind: input, shape index: {}]   ;;  %s1185_s7 = inlined_call_operand.hbm [shape: f32[2,8,256], index: 7, kind: output, shape index: {}]  }
   0x1   :  { %14 = vsyncpa [#allocation3 + $0x1], 0  ;;  %s1007_s24 = smov 0   ;;  %s1009_s25 = smov 0  }
   0x2   :  { %s1011_s26 = smov 0   ;;  %s1013_s27 = smov 0  }
   0x3   :  { %s1015_s28 = smov 0   ;;  %s1017_s29 = smov 0  }
   0x4 LB: > { %s800_s30 = sadd.s32 4294967295, %s962_s29   ;;  %s801_s8 = sadd.s32 4294967294, %s962_s29   ;;  %s962_s29 = sphi %s1017_s29, %s20_s29   ;;  %s958_s28 = sphi %s1015_s28, %s1192_s28   ;;  %s954_s27 = sphi %s1013_s27, %s1191_s27   ;;  %s950_s26 = sphi %s1011_s26, %s1190_s26   ;;  %s946_s25 = sphi %s1009_s25, %s1189_s25   ;;  %s942_s24 = sphi %s1007_s24, %s1188_s24  }
   0x5   : > { %s32_s9 = sadd.s32 1, %s958_s28  ;;  %s195_s10 = sadd.s32 1, %s950_s26 }
   0x6   : > { %p34_p0 = scmp.ge.s32.totalorder %s32_s9, 2  ;;  %p205_p1 = scmp.ne.s32.totalorder %s950_s26, %s946_s25 }
   0x7   : > { %p206_p2 = scmp.eq.s32.totalorder %s800_s30, 1  ;;  %p211_p3 = scmp.ne.s32.totalorder %s946_s25, %s942_s24 }
   0x8   : > { %s1194_s9 = smov (%p34_p0, %s32_s9), 0  ;;  %p212_p5 = scmp.eq.s32.totalorder %s801_s8, 1 }
   0x9   : > { %p1047_p4 = por %p206_p2, %p205_p1  ;;  %s190_s12 = ssub.s32 %s958_s28, %s1194_s9 }
   0xa   : > { %p804_p6 = scmp.ge.s32.totalorder %s962_s29, 1  ;;  %p193_p7 = scmp.eq.s32.totalorder %s190_s12, 0 }
   0xb   : > { %p1054_p8 = por %p212_p5, %p211_p3  ;;  %p261_p9 = scmp.lt.s32.totalorder %s962_s29, 3 }
   0xc   : > { %s1060_s14 = scalar_select %p193_p7, %s950_s26, %s195_s10  }
   0xd   : > { %p262_p10 = pnand %p804_p6, %p261_p9 }
   0xe   : > { %p298_p11 = scmp.lt.s32.totalorder (!%p262_p10), %s954_s27, 1  ;;  %s825_s19 = sshll.u32 (!%p262_p10), %s954_s27, 8 }
   0xf   : > { %265 = sbr.rel (%p262_p10) target bundleno = 680 (0x2a8), region = 48  ;;  %s722_s30 = scalar_lea.hbm (!%p262_p10), %s1185_s7, %s825_s19 }
  0x14   : > { %v964_v0 = vmov 0.0   ;;  %v316_v1 = vld [vmem:[%s1180_s2 + $0x18] sm:$0xff]  ;;  %s299_s17 = scalar_select %p298_p11, %s954_s27, 1  ;;  %v965_v2 = vmov 0   ;;  %v314_v3 = vld [vmem:[%s1180_s2 + $0x8] sm:$0xff]  ;;  %v315_v4 = vld [vmem:[%s1180_s2 + $0x10] sm:$0xff] }
  0x15   : > { %421 = vmatprep.mubr.f32.mxu0 %v964_v0  ;;  %575 = vmatprep.mubr.f32.mxu1 %v964_v0  ;;  %v313_v5 = vld [vmem:[%s1180_s2] sm:$0xff]  ;;  %vm352_vm0 = vcmask 1043456   ;;  %vm339_vm1 = vcmask 31744   ;;  %v477_v9 = vld [vmem:[%s1182_s4 + $0x18] sm:$0xff]  ;;  %v476_v10 = vld [vmem:[%s1182_s4 + $0x10] sm:$0xff]  ;;  %vm498_vm10 = vcmask 261120  }
  0x16   : > { %884 = vset.pattern.permute.xlu1 %v965_v2  ;;  %883 = vset.pattern.permute.xlu0 %v965_v2  ;;  %s824_s20 = sshll.u32 %s299_s17, 3  ;;  %v309_v8 = vld [vmem:[%s1179_s1] sm:$0xff]  ;;  %v310_v11 = vld [vmem:[%s1179_s1 + $0x8] sm:$0xff]  ;;  %v311_v14 = vld [vmem:[%s1179_s1 + $0x10] sm:$0xff]  ;;  %s294_s17 = sand.u32 1, %s946_s25  }
  0x17   : > { %334 = vperm.xlu0 %883, %v316_v1   ;;  %324 = vperm.xlu1 %884, %v314_v3   ;;  %s305_s12 = scalar_lea.vmem %s1178_s0, %s824_s20  ;;  %v475_v12 = vld [vmem:[%s1182_s4 + $0x8] sm:$0xff]  ;;  %v474_v13 = vld [vmem:[%s1182_s4] sm:$0xff]  ;;  %v312_v16 = vld [vmem:[%s1179_s1 + $0x18] sm:$0xff]  ;;  %s805_s18 = sshll.u32 %s294_s17, 4 }
  0x18   : > { %v308_v6 = vld [vmem:[%s305_s12] sm:$0xff]  ;;  %v471_v54 = vld [vmem:[%s1181_s3 + $0x8] sm:$0xff]  ;;  %v472_v55 = vld [vmem:[%s1181_s3 + $0x10] sm:$0xff]  ;;  %s296_s21 = scalar_lea.vmem [#allocation2], %s805_s18  ;;  %s708_s8 = scalar_lea.sflag [#allocation3], %s294_s17 }
  0x19   : > { %v338_v7 = vcombine.high %v308_v6, %v308_v6  ;;  %v625_v15 = vld [vmem:[%s1184_s6] sm:$0xff]  ;;  %v473_v56 = vld [vmem:[%s1181_s3 + $0x18] sm:$0xff]  ;;  %s724_s20 = sshll.u32 %s296_s21, 4  ;;  %s966_s12 = smov [#allocation2]   ;;  %s725_s20 = int_to_ptr.vmem [resolvable:$true] %s724_s20 }
  0x1a   : > { %v470_v52 = vld [vmem:[%s1181_s3] sm:$0xff]  ;;  %s886_s10 = scalar_lea.vmem %s725_s20, 256  ;;  %s890_s27 = sshll.u32 %s966_s12, 4  ;;  %s891_s27 = int_to_ptr.vmem [resolvable:$false] %s890_s27 }
  0x1b   : > { %329 = vperm.xlu0 %883, %v315_v4   ;;  %319 = vperm.xlu1 %884, %v313_v5   ;;  %p887_p12 = scmp.ne.s32.totalorder %s725_s20, %s886_s10  ;;  %s892_s15 = scalar_lea.vmem %s891_s27, 512 }
  0x1c   : > { %808 = vmatprep.subr.msk.mxu0 %vm352_vm0, %v338_v7  ;;  %p893_p1 = scmp.lt.s32.totalorder %s725_s20, %s891_s27  ;;  %p894_p2 = scmp.lt.s32.totalorder %s892_s15, %s886_s10 }
  0x1d   : > { %809 = vmatpush1.msk.msra.mxu0 %vm352_vm0, %v308_v6  ;;  %p888_p13 = pnand %p887_p12, %p1047_p4 }
  0x1e   : > { %810 = vmatmul.mubr.msk.f32.vlgmr.msra.gmra.mxu0 %vm339_vm1, %v309_v8  ;;  %p895_p3 = por %p894_p2, %p893_p1 }
  0x1f   : > { %495 = vperm.xlu0 %883, %v477_v9   ;;  %427 = vmatprep.mubr.f32.mxu0 %v964_v0  ;;  %p889_p0 = pneg %p888_p13 }
  0x20   : > { %490 = vperm.xlu1 %884, %v476_v10  }
  0x21   : > { %p896_p5 = pnand %p895_p3, %p889_p0 }
  0x22   : > { %811 = vmatmul.mubr.msk.f32.gmra.mxu0 %vm339_vm1, %v310_v11 }
  0x23   : > { %485 = vperm.xlu0 %883, %v475_v12   ;;  %433 = vmatprep.mubr.f32.mxu0 %v964_v0 }
  0x24   : > { %480 = vperm.xlu1 %884, %v474_v13  }
  0x26   : > { %812 = vmatmul.mubr.msk.f32.gmra.mxu0 %vm339_vm1, %v311_v14 }
  0x27   : > { %628 = vperm.xlu0 %883, %v625_v15   ;;  %439 = vmatprep.mubr.f32.mxu0 %v964_v0 }
  0x2a   : > { %813 = vmatmul.mubr.msk.f32.gmra.mxu0 %vm339_vm1, %v312_v16 }
  0x2b   : > { %698 = vmatprep.mubr.f32.mxu0 %v964_v0 }
  0x92   : > { %v335_v20 = vpop.permute.xlu0 %334  ;;  %v325_v23 = vpop.permute.xlu1 %324 }
  0x96   : > { %v330_v25 = vpop.permute.xlu0 %329  ;;  %v320_v31 = vpop.permute.xlu1 %319 }
  0x9a   : > { %v496_v61 = vpop.permute.xlu0 %495 }
  0x9b   : > { %v491_v63 = vpop.permute.xlu1 %490 }
  0x9e   : > { %v486_v5 = vpop.permute.xlu0 %485 }
  0x9f   : > { %v481_v7 = vpop.permute.xlu1 %480 }
  0xde   : > { %v423_v17 = vpop.f32.mrf.mxu0 }
  0xdf   : > { %v424_v39 = vadd.f32 %v423_v17, %v320_v31 }
  0xe0   : > { %v425_v18 = vpop.f32.mrf.mxu0 }
  0xe1   : > { %v426_v34 = vadd.f32 %v425_v18, %v320_v31  ;;  %v454_v47 = vmul.f32 0.01, %v424_v39  ;;  %vm446_vm9 = vcmp.gt.f32.partialorder %v424_v39, 0.0 }
  0xe2   : > { %v429_v19 = vpop.f32.mrf.mxu0 }
  0xe3   : > { %v430_v35 = vadd.f32 %v429_v19, %v325_v23  ;;  %v455_v45 = vmul.f32 0.01, %v426_v34  ;;  %vm447_vm8 = vcmp.gt.f32.partialorder %v426_v34, 0.0  ;;  %v462_v53 = vsel %vm446_vm9, %v424_v39, %v454_v47 }
  0xe4   : > { %v431_v21 = vpop.f32.mrf.mxu0 }
  0xe5   : > { %v432_v32 = vadd.f32 %v431_v21, %v325_v23  ;;  %v456_v43 = vmul.f32 0.01, %v430_v35  ;;  %vm448_vm7 = vcmp.gt.f32.partialorder %v430_v35, 0.0  ;;  %v463_v51 = vsel %vm447_vm8, %v426_v34, %v455_v45 }
  0xe6   : > { %v435_v22 = vpop.f32.mrf.mxu0 }
  0xe7   : > { %v436_v29 = vadd.f32 %v435_v22, %v330_v25  ;;  %v457_v41 = vmul.f32 0.01, %v432_v32  ;;  %vm449_vm6 = vcmp.gt.f32.partialorder %v432_v32, 0.0  ;;  %v464_v50 = vsel %vm448_vm7, %v430_v35, %v456_v43 }
  0xe8   : > { %v437_v24 = vpop.f32.mrf.mxu0 }
  0xe9   : > { %v438_v27 = vadd.f32 %v437_v24, %v330_v25  ;;  %v458_v40 = vmul.f32 0.01, %v436_v29  ;;  %vm450_vm5 = vcmp.gt.f32.partialorder %v436_v29, 0.0  ;;  %v465_v49 = vsel %vm449_vm6, %v432_v32, %v457_v41 }
  0xea   : > { %v441_v26 = vpop.f32.mrf.mxu0 }
  0xeb   : > { %v442_v28 = vadd.f32 %v441_v26, %v335_v20  ;;  %v459_v37 = vmul.f32 0.01, %v438_v27  ;;  %vm451_vm4 = vcmp.gt.f32.partialorder %v438_v27, 0.0  ;;  %v466_v48 = vsel %vm450_vm5, %v436_v29, %v458_v40 }
  0xec   : > { %v443_v30 = vpop.f32.mrf.mxu0 }
  0xed   : > { %v444_v33 = vadd.f32 %v443_v30, %v335_v20  ;;  %v460_v36 = vmul.f32 0.01, %v442_v28  ;;  %vm452_vm3 = vcmp.gt.f32.partialorder %v442_v28, 0.0  ;;  %v467_v46 = vsel %vm451_vm4, %v438_v27, %v459_v37  ;;  %v629_v30 = vpop.permute.xlu0 %628 }
  0xef   : > { %vm453_vm2 = vcmp.gt.f32.partialorder %v444_v33, 0.0  ;;  %v461_v38 = vmul.f32 0.01, %v444_v33  ;;  %v468_v44 = vsel %vm452_vm3, %v442_v28, %v460_v36  ;;  %v624_v28 = vld [vmem:[%s1183_s5] sm:$0xff] }
  0xf1   : > { %v469_v42 = vsel %vm453_vm2, %v444_v33, %v461_v38 }
  0xf2   : > { %535 = vmatprep.subr.mxu1 %v469_v42 }
  0xf3   : > { %536 = vmatpush1.msra.mxu1 %v468_v44 }
  0xf4   : > { %537 = vmatprep.subr.mxu1 %v467_v46 }
  0xf5   : > { %538 = vmatpush1.msra.mxu1 %v466_v48 }
  0xf6   : > { %539 = vmatprep.subr.mxu1 %v465_v49 }
  0xf7   : > { %540 = vmatpush1.msra.mxu1 %v464_v50 }
  0xf8   : > { %541 = vmatprep.subr.mxu1 %v463_v51 }
  0xf9   : > { %542 = vmatpush1.msra.mxu1 %v462_v53 }
  0xfa   : > { %814 = vmatmul.mubr.msk.f32.vlgmr.msra.gmra.mxu1 %vm498_vm10, %v470_v52 }
  0xfb   : > { %581 = vmatprep.mubr.f32.mxu1 %v964_v0 }
  0xfe   : > { %815 = vmatmul.mubr.msk.f32.gmra.mxu1 %vm498_vm10, %v471_v54 }
  0xff   : > { %587 = vmatprep.mubr.f32.mxu1 %v964_v0 }
 0x102   : > { %816 = vmatmul.mubr.msk.f32.gmra.mxu1 %vm498_vm10, %v472_v55 }
 0x103   : > { %593 = vmatprep.mubr.f32.mxu1 %v964_v0 }
 0x106   : > { %817 = vmatmul.mubr.msk.f32.gmra.mxu1 %vm498_vm10, %v473_v56 }
 0x1ba   : > { %v577_v57 = vpop.f32.mrf.mxu1 }
 0x1bb   : > { %v578_v15 = vadd.f32 %v577_v57, %v481_v7 }
 0x1bc   : > { %v579_v58 = vpop.f32.mrf.mxu1 }
 0x1bd   : > { %v580_v10 = vadd.f32 %v579_v58, %v481_v7  ;;  %v608_v23 = vmul.f32 0.01, %v578_v15  ;;  %vm600_vm2 = vcmp.gt.f32.partialorder %v578_v15, 0.0 }
 0x1be   : > { %v583_v59 = vpop.f32.mrf.mxu1 }
 0x1bf   : > { %v584_v11 = vadd.f32 %v583_v59, %v486_v5  ;;  %v609_v21 = vmul.f32 0.01, %v580_v10  ;;  %vm601_vm1 = vcmp.gt.f32.partialorder %v580_v10, 0.0  ;;  %v616_v29 = vsel %vm600_vm2, %v578_v15, %v608_v23 }
 0x1c0   : > { %v585_v60 = vpop.f32.mrf.mxu1 }
 0x1c1   : > { %v586_v8 = vadd.f32 %v585_v60, %v486_v5  ;;  %v610_v19 = vmul.f32 0.01, %v584_v11  ;;  %vm602_vm0 = vcmp.gt.f32.partialorder %v584_v11, 0.0  ;;  %v617_v27 = vsel %vm601_vm1, %v580_v10, %v609_v21 }
 0x1c2   : > { %v589_v62 = vpop.f32.mrf.mxu1 }
 0x1c3   : > { %v590_v6 = vadd.f32 %v589_v62, %v491_v63  ;;  %v611_v17 = vmul.f32 0.01, %v586_v8  ;;  %vm603_vm15 = vcmp.gt.f32.partialorder %v586_v8, 0.0  ;;  %v618_v26 = vsel %vm602_vm0, %v584_v11, %v610_v19 }
 0x1c4   : > { %v591_v1 = vpop.f32.mrf.mxu1 }
 0x1c5   : > { %v592_v3 = vadd.f32 %v591_v1, %v491_v63  ;;  %v612_v16 = vmul.f32 0.01, %v590_v6  ;;  %vm604_vm14 = vcmp.gt.f32.partialorder %v590_v6, 0.0  ;;  %v619_v25 = vsel %vm603_vm15, %v586_v8, %v611_v17 }
 0x1c6   : > { %v595_v2 = vpop.f32.mrf.mxu1 }
 0x1c7   : > { %v596_v4 = vadd.f32 %v595_v2, %v496_v61  ;;  %v613_v13 = vmul.f32 0.01, %v592_v3  ;;  %vm605_vm13 = vcmp.gt.f32.partialorder %v592_v3, 0.0  ;;  %v620_v24 = vsel %vm604_vm14, %v590_v6, %v612_v16 }
 0x1c8   : > { %v597_v0 = vpop.f32.mrf.mxu1 }
 0x1c9   : > { %v598_v9 = vadd.f32 %v597_v0, %v496_v61  ;;  %v614_v12 = vmul.f32 0.01, %v596_v4  ;;  %vm606_vm11 = vcmp.gt.f32.partialorder %v596_v4, 0.0  ;;  %v621_v22 = vsel %vm605_vm13, %v592_v3, %v613_v13 }
 0x1cb   : > { %v615_v14 = vmul.f32 0.01, %v598_v9  ;;  %vm607_vm12 = vcmp.gt.f32.partialorder %v598_v9, 0.0  ;;  %v622_v20 = vsel %vm606_vm11, %v596_v4, %v614_v12 }
 0x1cd   : > { %v623_v18 = vsel %vm607_vm12, %v598_v9, %v615_v14 }
 0x1ce   : > { %658 = vmatprep.subr.mxu0 %v623_v18 }
 0x1cf   : > { %659 = vmatpush1.msra.mxu0 %v622_v20 }
 0x1d0   : > { %660 = vmatprep.subr.mxu0 %v621_v22 }
 0x1d1   : > { %661 = vmatpush1.msra.mxu0 %v620_v24 }
 0x1d2   : > { %662 = vmatprep.subr.mxu0 %v619_v25 }
 0x1d3   : > { %663 = vmatpush1.msra.mxu0 %v618_v26 }
 0x1d4   : > { %664 = vmatprep.subr.mxu0 %v617_v27 }
 0x1d5   : > { %665 = vmatpush1.msra.mxu0 %v616_v29 }
 0x1d6   : > { %818 = vmatmul.mubr.msk.f32.vlgmr.msra.gmra.mxu0 %vm498_vm10, %v624_v28 }
 0x296   : > { %v700_v31 = vpop.f32.mrf.mxu0 }
 0x297   : > { %v701_v32 = vadd.f32 %v700_v31, %v629_v30 }
 0x298   : > { %v702_v33 = vpop.f32.mrf.mxu0 }
 0x299   : > { %705 = vst [vmem:[%s296_s21] sm:$0xff] %v701_v32  ;;  %v703_v34 = vadd.f32 %v702_v33, %v629_v30 }
 0x29b   : > { %706 = vst [vmem:[%s296_s21 + $0x8] sm:$0xff] %v703_v34 }
 0x29c   : > { %899 = shalt.err (!%p896_p5)
}
 0x29d   : > { %s900_s16 = scalar_lea.hbm %s722_s30, 256  ;;  %s904_s19 = scalar_lea.hbm %s1185_s7, 512 }
 0x29e   : > { %p901_p6 = scmp.ne.s32.totalorder %s722_s30, %s900_s16  ;;  %p905_p10 = scmp.lt.s32.totalorder %s722_s30, %s1185_s7 }
 0x29f   : > { %p906_p11 = scmp.lt.s32.totalorder %s904_s19, %s900_s16 }
 0x2a0   : > { %p902_p7 = pnand %p901_p6, %p1047_p4 }
 0x2a1   : > { %p907_p12 = por %p906_p11, %p905_p10 }
 0x2a2   : > { %p903_p9 = pneg %p902_p7 }
 0x2a4   : > { %p908_p13 = pnand %p907_p12, %p903_p9 }
 0x2a6   : > { %911 = shalt.err (!%p908_p13)
}
 0x2a7   : > { %826 = dma.vmem_to_hbm [thread:$0]  (%p1047_p4), %s725_s20, 256, %s722_s30, %s708_s8  }
 0x2a8 PF: > { %p832_p0 = scmp.ge.s32.totalorder %s962_s29, 2  ;;  %s736_s23 = sand.u32 1, %s942_s24  }
 0x2a9   : > { %s737_s10 = scalar_lea.sflag [#allocation3], %s736_s23 }
 0x2aa   : > { %p829_p1 = pnand %p832_p0, %p1054_p8 }
 0x2ac   : > { %p830_p2 = pneg %p829_p1 }
 0x2ae   : > { %937 = dma.done.wait (%p830_p2), %s737_s10, 256  }
 0x2af   : > { %939 = vsyncadd (%p830_p2), %s737_s10, 4294967040  ;;  %s20_s29 = sadd.s32 1, %s962_s29   ;;  %s1188_s24 = smov %s946_s25 }
 0x2b0   : > { %p17_p3 = scmp.ge.s32.totalorder %s20_s29, 4   ;;  %s1189_s25 = smov %s950_s26 }
 0x2b1   : > { %s1190_s26 = smov %s1060_s14  ;;  %s1191_s27 = smov %s958_s28 }
 0x2b2   : > { %s1192_s28 = smov %s1194_s9  ;;  %19 = sbr.rel (!%p17_p3) target bundleno = 4 (0x4), region = 83 }
 0x2b7   :  { %742 = vsyncpa [#allocation3], 1 }
 0x2b8   :  { %744 = vsyncpa [#allocation3 + $0x1], 1 }

</bundles_post_ra>
